<compile_context>
chip_gen: v7x
topology: tpu7x:2x2x1
jax: 0.10.0
libtpu: 0.0.40
codegen_flags: <defaults>
</compile_context>

<pallas_src>
import jax
import jax.numpy as jnp
from jax.experimental import pallas as pl
from jax.experimental.pallas import tpu as pltpu


def _round_up(x, m):
    return -(-x // m) * m


def _transe_kernel_dot(u_ref, v_ref, r_ref, s_ref, o_ref):
    """u_ref, v_ref: (tm, Dp) native dtype; r_ref: (1, Dp) f32; s_ref: (Dp, k) f32."""
    diff = u_ref[...].astype(jnp.float32) - v_ref[...].astype(jnp.float32) + r_ref[...]
    d2 = diff * diff
    # Segmented lane reduction as a single MXU matmul against a constant selector.
    o_ref[...] = jnp.dot(d2, s_ref[...], preferred_element_type=jnp.float32)


def _transe_kernel_sum(u_ref, v_ref, r_ref, o_ref):
    """Unpacked path (k == 1): plain XLU row reduction."""
    diff = u_ref[...].astype(jnp.float32) - v_ref[...].astype(jnp.float32) + r_ref[...]
    d2 = diff * diff
    o_ref[...] = jnp.sum(d2, axis=-1, keepdims=True)


def transe_distance(u, v, r, *, target_block_bytes=2 * 1024 * 1024, max_tile_rows=8192):
    """Pallas TPU implementation of TranseDistance.forward.

    u, v: (B, D) or (B, N, D) arrays (any float dtype); r: (1, D) parameter.
    Returns sum((u - v + r)**2, axis=-1) in float32 with shape u.shape[:-1].
    """
    orig_batch_shape = u.shape[:-1]
    D = u.shape[-1]
    assert v.shape == u.shape and r.shape[-1] == D

    # Free row-major reshapes; keep native dtype in HBM (no extra HBM pass).
    u2 = u.reshape(-1, D)
    v2 = v.reshape(-1, D)
    M = u2.shape[0]
    itemsize = u2.dtype.itemsize

    # Lane packing (free reshape): pack k rows per 128-wide lane row when D is a
    # small divisor of 128 and M % k == 0 (otherwise fall back — never pad).
    k = 128 // D if (D < 128 and 128 % D == 0) else 1
    if k > 1 and M % k != 0:
        k = 1
    Dp = k * D
    Mp = M // k
    up = u2.reshape(Mp, Dp)
    vp = v2.reshape(Mp, Dp)
    rp = jnp.tile(r.reshape(1, D).astype(jnp.float32), (1, k))          # (1, Dp), tiny

    # Row tile: size each input block against VMEM using the lane-padded width,
    # multiple of 8 rows, and clip so the grid has >= 2 steps when the problem
    # is big enough (megacore sharding on v7x).
    Dvmem = _round_up(Dp, 128)
    if Mp <= 8:
        tm = Mp                                  # block == full array dims (allowed)
    else:
        tm = max(8, min(max_tile_rows, target_block_bytes // (Dvmem * itemsize)))
        tm = (tm // 8) * 8
        tm = min(tm, _round_up(pl.cdiv(Mp, 2), 8))
    grid = (pl.cdiv(Mp, tm),)                    # partial edge block; no jnp.pad

    # VMEM budget: 2 inputs x 2 buffers + f32 elementwise temporaries + lane-padded
    # output double buffer + headroom. Cap at 40 MiB (safe on v7x's 64 MiB VMEM).
    vmem_est = (4 * tm * Dvmem * itemsize        # u, v double-buffered
                + 3 * tm * Dvmem * 4             # diff / d2 f32 temporaries
                + 4 * tm * 128 * 4               # output blocks (lane-padded)
                + (2 << 20))
    vmem_limit = int(min(max(vmem_est, 24 << 20), 40 << 20))

    cost = pl.CostEstimate(
        flops=5 * M * D,
        transcendentals=0,
        bytes_accessed=2 * M * D * itemsize + M * 4 + (D + Dp * k) * 4,
    )

    uv_spec = pl.BlockSpec((tm, Dp), lambda i: (i, 0))
    r_spec = pl.BlockSpec((1, Dp), lambda i: (0, 0))
    out_spec = pl.BlockSpec((tm, k), lambda i: (i, 0))
    common = dict(
        out_shape=jax.ShapeDtypeStruct((Mp, k), jnp.float32),
        compiler_params=pltpu.CompilerParams(
            dimension_semantics=("parallel",),   # megacore sharding on v7x
            vmem_limit_bytes=vmem_limit,
        ),
        cost_estimate=cost,
    )

    if k > 1:
        # Constant segment selector: column j is 1 on lanes [j*D, (j+1)*D).
        sel = jnp.repeat(jnp.eye(k, dtype=jnp.float32), D, axis=0)      # (Dp, k)
        out = pl.pallas_call(
            _transe_kernel_dot,
            grid_spec=pltpu.PrefetchScalarGridSpec(
                num_scalar_prefetch=0,
                grid=grid,
                in_specs=[uv_spec, uv_spec, r_spec,
                          pl.BlockSpec((Dp, k), lambda i: (0, 0))],
                out_specs=out_spec,
            ),
            **common,
        )(up, vp, rp, sel)
    else:
        out = pl.pallas_call(
            _transe_kernel_sum,
            grid_spec=pltpu.PrefetchScalarGridSpec(
                num_scalar_prefetch=0,
                grid=grid,
                in_specs=[uv_spec, uv_spec, r_spec],
                out_specs=out_spec,
            ),
            **common,
        )(up, vp, rp)

    return out.reshape(orig_batch_shape)


def reference(u, v, r):
    uf = u.astype(jnp.float32)
    vf = v.astype(jnp.float32)
    rf = r.astype(jnp.float32).reshape((1,) * (u.ndim - 1) + (-1,))
    return jnp.sum(jnp.square(uf - vf + rf), axis=-1)


if __name__ == "__main__":
    key = jax.random.PRNGKey(0)
    k1, k2, k3, k4, k5, k6, k7 = jax.random.split(key, 7)

    B, N, D = 2, 8, 32

    # deterministic "parameter" init (stand-in for th.randn(dim).view(1, dim))
    r = jax.random.normal(k1, (1, D), dtype=jnp.float32)

    # 3D case: u, v of shape (B, N, D), f32 (lane-packed, k=4, single-step grid)
    u3 = jax.random.normal(k2, (B, N, D), dtype=jnp.float32)
    v3 = jax.random.normal(k3, (B, N, D), dtype=jnp.float32)
    out3 = transe_distance(u3, v3, r)
    jax.block_until_ready(out3)
    assert out3.shape == (B, N)
    assert jnp.allclose(out3, reference(u3, v3, r), atol=1e-4, rtol=1e-4)

    # 2D case: u, v of shape (B, D), f32 (unpacked fallback path)
    u2 = jax.random.normal(k4, (B, D), dtype=jnp.float32)
    v2 = jax.random.normal(k5, (B, D), dtype=jnp.float32)
    out2 = transe_distance(u2, v2, r)
    jax.block_until_ready(out2)
    assert out2.shape == (B,)
    assert jnp.allclose(out2, reference(u2, v2, r), atol=1e-4, rtol=1e-4)

    # bf16 case with a multi-step parallel grid (native-dtype DMA, in-kernel cast)
    Bb, Nb = 4, 96
    ub = jax.random.normal(k6, (Bb, Nb, D), dtype=jnp.bfloat16)
    vb = jax.random.normal(k7, (Bb, Nb, D), dtype=jnp.bfloat16)
    outb = transe_distance(ub, vb, r)
    jax.block_until_ready(outb)
    assert outb.shape == (Bb, Nb)
    assert jnp.allclose(outb, reference(ub, vb, r), atol=1e-3, rtol=1e-3)

    print("KERNEL_OK")
</pallas_src>

<mosaic_0001>
module attributes {stable_mosaic.version = 11 : i64} {
  func.func @_transe_kernel_dot(%arg0: i32, %arg1: memref<4x128xf32, #tpu.memory_space<vmem>>, %arg2: memref<4x128xf32, #tpu.memory_space<vmem>>, %arg3: memref<1x128xf32, #tpu.memory_space<vmem>>, %arg4: memref<128x4xf32, #tpu.memory_space<vmem>>, %arg5: memref<4x4xf32, #tpu.memory_space<vmem>>) attributes {dimension_semantics = [#tpu.dimension_semantics<parallel>], iteration_bounds = array<i64: 1>, scalar_prefetch = 0 : i64, scratch_operands = 0 : i64, tpu.core_type = #tpu.core_type<tc>, window_params = [{transform_indices = @transform_0, window_bounds = array<i64: 4, 128>}, {transform_indices = @transform_1, window_bounds = array<i64: 4, 128>}, {pipeline_mode = #tpu.pipeline_mode<synchronous>, transform_indices = @transform_2, window_bounds = array<i64: 1, 128>}, {pipeline_mode = #tpu.pipeline_mode<synchronous>, transform_indices = @transform_3, window_bounds = array<i64: 128, 4>}, {transform_indices = @transform_4, window_bounds = array<i64: 4, 4>}]} {
    %c0 = arith.constant 0 : index
    %c0_0 = arith.constant 0 : index
    %0 = vector.load %arg1[%c0, %c0_0] : memref<4x128xf32, #tpu.memory_space<vmem>>, vector<4x128xf32>
    %c0_1 = arith.constant 0 : index
    %c0_2 = arith.constant 0 : index
    %1 = vector.load %arg2[%c0_1, %c0_2] : memref<4x128xf32, #tpu.memory_space<vmem>>, vector<4x128xf32>
    %2 = arith.subf %0, %1 : vector<4x128xf32>
    %c0_3 = arith.constant 0 : index
    %c0_4 = arith.constant 0 : index
    %3 = vector.load %arg3[%c0_3, %c0_4] : memref<1x128xf32, #tpu.memory_space<vmem>>, vector<1x128xf32>
    %4 = vector.broadcast %3 : vector<1x128xf32> to vector<4x128xf32>
    %5 = arith.addf %2, %4 : vector<4x128xf32>
    %6 = arith.mulf %5, %5 : vector<4x128xf32>
    %c0_5 = arith.constant 0 : index
    %c0_6 = arith.constant 0 : index
    %7 = vector.load %arg4[%c0_5, %c0_6] : memref<128x4xf32, #tpu.memory_space<vmem>>, vector<128x4xf32>
    %cst = arith.constant dense<0.000000e+00> : vector<4x4xf32>
    %8 = tpu.matmul %6, %7, %cst {dimension_numbers = #tpu.dot_dimension_numbers<[1], [0], [0], [1], [0, 0, 1, 1], [], []>} : vector<4x128xf32>, vector<128x4xf32>, vector<4x4xf32> -> vector<4x4xf32>
    %c0_7 = arith.constant 0 : index
    %c0_8 = arith.constant 0 : index
    %9 = vector.load %arg5[%c0_7, %c0_8] : memref<4x4xf32, #tpu.memory_space<vmem>>, vector<4x4xf32>
    tpu.vector_store %arg5[%c0_7, %c0_8], %8 {strides = array<i32>} : memref<4x4xf32, #tpu.memory_space<vmem>>, vector<4x4xf32>,
    return
  }
  func.func @transform_0(%arg0: i32) -> (i32, i32) {
    %c0_i32 = arith.constant 0 : i32
    %c0_i32_0 = arith.constant 0 : i32
    return %arg0, %c0_i32 : i32, i32
  }
  func.func @transform_1(%arg0: i32) -> (i32, i32) {
    %c0_i32 = arith.constant 0 : i32
    %c0_i32_0 = arith.constant 0 : i32
    return %arg0, %c0_i32 : i32, i32
  }
  func.func @transform_2(%arg0: i32) -> (i32, i32) {
    %c0_i32 = arith.constant 0 : i32
    %c0_i32_0 = arith.constant 0 : i32
    %c0_i32_1 = arith.constant 0 : i32
    return %c0_i32, %c0_i32_0 : i32, i32
  }
  func.func @transform_3(%arg0: i32) -> (i32, i32) {
    %c0_i32 = arith.constant 0 : i32
    %c0_i32_0 = arith.constant 0 : i32
    %c0_i32_1 = arith.constant 0 : i32
    return %c0_i32, %c0_i32_0 : i32, i32
  }
  func.func @transform_4(%arg0: i32) -> (i32, i32) {
    %c0_i32 = arith.constant 0 : i32
    %c0_i32_0 = arith.constant 0 : i32
    return %arg0, %c0_i32 : i32, i32
  }
}

</mosaic_0001>

<bundles_post_ra>
// kernel: tpu_custom_call.1
= control target key start
LH: loop header
LB: loop body
LE: loop exit
PB: predicated region body
PF: predicated region fallthrough
CT: control target
= control target key end

     0   :  { %v237_v3 = vmov 0.0|0.0   ;;  %vm238_vm0 = vmmov 0   ;;  %v239_v6 = vmov 0.0   ;;  %s335_s0 = inlined_call_operand.vmem [shape: f32[4,128], index: 0, kind: input, shape index: {}]   ;;  %s336_s1 = inlined_call_operand.vmem [shape: f32[4,128], index: 1, kind: input, shape index: {}]   ;;  %s337_s2 = inlined_call_operand.vmem [shape: f32[1,128], index: 2, kind: input, shape index: {}]   ;;  %s338_s3 = inlined_call_operand.vmem [shape: f32[128,4], index: 3, kind: input, shape index: {}]   ;;  %s339_s4 = inlined_call_operand.hbm [shape: f32[4,4], index: 4, kind: output, shape index: {}]  }
   0x1   :  { %v30_v0 = vld [vmem:[%s338_s3] sm:$0xff]  ;;  %v31_v1 = vld [vmem:[%s338_s3 + $0x8] sm:$0xff]  ;;  %v32_v2 = vld [vmem:[%s338_s3 + $0x10] sm:$0xff]  ;;  %185 = vmatprep.subr.bf16.mxu0 %v237_v3  ;;  %182 = vmatprep.mubr.msk.f32.mxu0 %vm238_vm0, %v239_v6 }
   0x2   :  { %v186_v4 = vpack.c.bf16 %v31_v1, %v30_v0  ;;  %v33_v5 = vld [vmem:[%s338_s3 + $0x18] sm:$0xff]  ;;  %v34_v8 = vld [vmem:[%s338_s3 + $0x20] sm:$0xff]  ;;  %v35_v9 = vld [vmem:[%s338_s3 + $0x28] sm:$0xff] }
   0x3   :  { %v189_v7 = vpack.c.bf16 %v33_v5, %v32_v2 }
   0x4   :  { %187 = vmatpush3.bf16.msra.mxu0 %v186_v4 }
   0x5   :  { %188 = vmatprep.subr.bf16.mxu0 %v237_v3 }
   0x6   :  { %9 = vsyncpa [#allocation3], 0  ;;  %v192_v10 = vpack.c.bf16 %v35_v9, %v34_v8  ;;  %v36_v11 = vld [vmem:[%s338_s3 + $0x30] sm:$0xff]  ;;  %v37_v12 = vld [vmem:[%s338_s3 + $0x38] sm:$0xff]  ;;  %s240_s25 = smov [#allocation2]   ;;  %vm116_vm1 = vcmask 27648  }
   0x7   :  { %v195_v13 = vpack.c.bf16 %v37_v12, %v36_v11  ;;  %v38_v14 = vld [vmem:[%s338_s3 + $0x40] sm:$0xff]  ;;  %v39_v15 = vld [vmem:[%s338_s3 + $0x48] sm:$0xff]  ;;  %v40_v17 = vld [vmem:[%s338_s3 + $0x50] sm:$0xff]  ;;  %s124_s26 = sshll.u32 %s240_s25, 4  ;;  %s125_s26 = int_to_ptr.vmem [resolvable:$true] %s124_s26 }
   0x8   :  { %190 = vmatpush3.bf16.msra.mxu0 %v189_v7  ;;  %v198_v16 = vpack.c.bf16 %v39_v15, %v38_v14  ;;  %v41_v18 = vld [vmem:[%s338_s3 + $0x58] sm:$0xff]  ;;  %v18_v20 = vld [vmem:[%s335_s0] sm:$0xf]  ;;  %v43_v23 = vld [vmem:[%s338_s3 + $0x68] sm:$0xff]  ;;  %p218_p1 = scmp.lt.s32.totalorder %s125_s26, %s125_s26 }
   0x9   :  { %191 = vmatprep.subr.bf16.mxu0 %v237_v3  ;;  %v201_v19 = vpack.c.bf16 %v41_v18, %v40_v17  ;;  %v19_v21 = vld [vmem:[%s336_s1] sm:$0xf]  ;;  %v44_v27 = vld [vmem:[%s338_s3 + $0x70] sm:$0xff]  ;;  %v45_v28 = vld [vmem:[%s338_s3 + $0x78] sm:$0xff] }
   0xa   :  { %v42_v22 = vld [vmem:[%s338_s3 + $0x60] sm:$0xff]  ;;  %v20_v24 = vsub.f32 %v18_v20, %v19_v21  ;;  %v207_v30 = vpack.c.bf16 %v45_v28, %v44_v27 }
   0xb   :  { %v204_v25 = vpack.c.bf16 %v43_v23, %v42_v22  ;;  %v132_v26 = vld [vmem:[%s337_s2] ss:$0 sm:$0xff]  ;;  %s213_s2 = scalar_lea.vmem %s125_s26, 64 }
   0xc   :  { %193 = vmatpush3.bf16.msra.mxu0 %v192_v10  ;;  %v28_v29 = vadd.f32 %v132_v26, %v20_v24  ;;  %p214_p0 = scmp.ne.s32.totalorder %s125_s26, %s213_s2  ;;  %p219_p2 = scmp.lt.s32.totalorder %s213_s2, %s213_s2 }
   0xd   :  { %194 = vmatprep.subr.bf16.mxu0 %v237_v3 }
   0xe   :  { %v29_v31 = vmul.f32 %v28_v29, %v28_v29  ;;  %p220_p3 = por %p219_p2, %p218_p1 }
  0x10   :  { %196 = vmatpush3.bf16.msra.mxu0 %v195_v13  ;;  %p221_p4 = pnand %p220_p3, %p214_p0 }
  0x11   :  { %197 = vmatprep.subr.bf16.mxu0 %v237_v3 }
  0x14   :  { %199 = vmatpush3.bf16.msra.mxu0 %v198_v16 }
  0x15   :  { %200 = vmatprep.subr.bf16.mxu0 %v237_v3 }
  0x18   :  { %202 = vmatpush3.bf16.msra.mxu0 %v201_v19 }
  0x19   :  { %203 = vmatprep.subr.bf16.mxu0 %v237_v3 }
  0x1c   :  { %205 = vmatpush3.bf16.msra.mxu0 %v204_v25 }
  0x1d   :  { %206 = vmatprep.subr.bf16.mxu0 %v237_v3 }
  0x20   :  { %208 = vmatpush3.bf16.msra.mxu0 %v207_v30 }
  0x23   :  { %183 = vmatmul.mubr.f32.vlgmr.msra.gmra.mrb[0].mxu0 %v29_v31 }
  0xf6   :  { %v112_v32 = vpop.f32.mrb[0].mxu0 }
  0xf7   :  { %117 = vst.msk [vmem:[#allocation2] sm:$0xf] %vm116_vm1, %v112_v32  ;;  %v184_v33 = vpop.f32.mrb[1].mxu0 }
  0xf8   :  { %224 = shalt.err (!%p221_p4)
}
  0xf9   :  { %s225_s28 = scalar_lea.hbm %s339_s4, 64 }
  0xfa   :  { %p226_p5 = scmp.ne.s32.totalorder %s339_s4, %s225_s28  ;;  %p229_p6 = scmp.lt.u32.totalorder %s225_s28, %s339_s4 }
  0xfc   :  { %p231_p7 = pnand %p229_p6, %p226_p5 }
  0xfe   :  { %234 = shalt.err (!%p231_p7)
}
  0xff   :  { %127 = dma.vmem_to_hbm [thread:$0]  %s125_s26, 64, %s339_s4, [#allocation3]  }
 0x100   :  { %235 = dma.done.wait [#allocation3], 64  }
 0x101   :  { %236 = vsyncadd [#allocation3], 4294967232 }
 0x102   :  { %131 = vsyncpa [#allocation3], 1 }

</bundles_post_ra>
